<compile_context>
chip_gen: v5e
topology: v5e:2x2
jax: 0.10.0
libtpu: 0.0.40
codegen_flags: <defaults>
</compile_context>

<pallas_src>
from functools import partial

import jax
import jax.numpy as jnp
from jax.experimental import pallas as pl
from jax.experimental.pallas import tpu as pltpu

LANE = 128
VMEM_LIMIT = 32 * 1024 * 1024  # explicit scoped-VMEM limit; safe on v5e/v6e/v7x


def _round_up(n, m):
    return pl.cdiv(n, m) * m


def _pad_to(a, shape):
    return jnp.pad(a, [(0, s - d) for s, d in zip(shape, a.shape)])


# -----------------------------------------------------------------------------
# Kernel 1: standalone 3-layer MLP (Encoding_model hot path), row-tiled
#   y = relu(x @ W1 + b1); y = relu(y @ W2); out = y @ W3   (Dropout = identity in eval)
# -----------------------------------------------------------------------------
def _mlp_kernel(x_ref, w1_ref, b1_ref, w2_ref, w3_ref, o_ref):
    # x arrives f32/unpadded; cast to bf16 for the MXU (f32 accumulation everywhere).
    x = x_ref[...].astype(jnp.bfloat16)
    h = jnp.dot(x, w1_ref[...], preferred_element_type=jnp.float32)
    h = jnp.maximum(h + b1_ref[...], 0.0)
    h = jnp.dot(h.astype(jnp.bfloat16), w2_ref[...], preferred_element_type=jnp.float32)
    h = jnp.maximum(h, 0.0)
    o_ref[...] = jnp.dot(h.astype(jnp.bfloat16), w3_ref[...],
                         preferred_element_type=jnp.float32).astype(o_ref.dtype)


def mlp_encoding_forward(x, w1p, b1p, w2p, w3p, d_out, *, tm=512):
    """x: (N, Din) f32 (unpadded).  w1p: (Din, Dh) bf16, b1p: (1, Dh) f32,
    w2p: (Dh, Dh) bf16, w3p: (Dh, Dop) bf16 (Dop lane-padded).  Returns (N, d_out) f32."""
    N, Din = x.shape
    Dh = w2p.shape[0]
    Dop = w3p.shape[1]
    # Row tile: multiple of 8 sublanes, capped at `tm`; ragged last block handled by Pallas.
    tm = max(8, min(_round_up(tm, 8), _round_up(N, 8)))
    grid = (pl.cdiv(N, tm),)

    out = pl.pallas_call(
        _mlp_kernel,
        out_shape=jax.ShapeDtypeStruct((N, Dop), jnp.float32),
        grid_spec=pltpu.PrefetchScalarGridSpec(
            num_scalar_prefetch=0,
            grid=grid,
            in_specs=[
                pl.BlockSpec((tm, Din), lambda i: (i, 0)),   # activations, unpadded K=Din
                pl.BlockSpec((Din, Dh), lambda i: (0, 0)),   # W1 (resident, bf16)
                pl.BlockSpec((1, Dh), lambda i: (0, 0)),     # b1 (f32)
                pl.BlockSpec((Dh, Dh), lambda i: (0, 0)),    # W2
                pl.BlockSpec((Dh, Dop), lambda i: (0, 0)),   # W3 (lane-dense output)
            ],
            out_specs=pl.BlockSpec((tm, Dop), lambda i: (i, 0)),  # unmasked (Dop=128) store
        ),
        compiler_params=pltpu.CompilerParams(
            dimension_semantics=("parallel",),               # v7x: 2 TCs split the row grid
            vmem_limit_bytes=VMEM_LIMIT),
    )(x.astype(jnp.float32), w1p, b1p, w2p, w3p)
    # Padded W3 columns are exactly zero, so only the column slice is needed.
    return out[:, :d_out]


# -----------------------------------------------------------------------------
# Kernel 2: fused tokenize — batch-folded MLP + assembly of the inputs_embeds slab
#   out[b] = concat([sep[b, :1], MLP(additional_bs[b]), sep[b, 1:], content_all[b]], axis=0)
# -----------------------------------------------------------------------------
def _fused_tokenize_kernel(x_ref, w1_ref, b1_ref, w2_ref, w3_ref, sep_ref, txt_ref,
                           o_ref, *, nb, s_sep, s_txt):
    # Encoding_model MLP with the batch folded into the matmul M dimension:
    # one (bb*nb, Din) chain instead of per-batch grid steps.
    x = x_ref[...].astype(jnp.bfloat16)
    h = jnp.dot(x, w1_ref[...], preferred_element_type=jnp.float32)
    h = jnp.maximum(h + b1_ref[...], 0.0)
    h = jnp.dot(h.astype(jnp.bfloat16), w2_ref[...], preferred_element_type=jnp.float32)
    h = jnp.maximum(h, 0.0)
    y = jnp.dot(h.astype(jnp.bfloat16), w3_ref[...],
                preferred_element_type=jnp.float32).astype(o_ref.dtype)   # (bb*nb, D)

    sep = sep_ref[...].astype(o_ref.dtype)   # (bb, s_sep, D)
    txt = txt_ref[...].astype(o_ref.dtype)   # (bb, s_txt, D)
    bb = sep.shape[0]

    # Assemble [sep[:, :1], mlp, sep[:, 1:], content_all] directly into the output slab
    # (no wrapper-side concat, no extra HBM round trip of the MLP output).
    # TODO(synk): at toy D=32 the row stores below are lane-masked; at real GPT-2/LLaMA D
    #             (768/4096) they are lane-dense, and a single-store assembly would need an
    #             unaligned sublane concat of the four pieces.
    for b in range(bb):                       # static unroll over the batch block
        o_ref[b, 0:1, :] = sep[b, 0:1, :]
        o_ref[b, pl.ds(1, nb), :] = y[b * nb:(b + 1) * nb, :]
        if s_sep > 1:
            o_ref[b, pl.ds(1 + nb, s_sep - 1), :] = sep[b, 1:, :]
        o_ref[b, pl.ds(nb + s_sep, s_txt), :] = txt[b]


def fused_tokenize(additional_bs, w1p, b1p, w2p, w3p, sep_emb, txt_emb,
                   *, batch_block=None, out_dtype=jnp.float32):
    """additional_bs: (B, Nb, Din) f32; sep_emb: (B, S_sep, D) f32; txt_emb: (B, S_txt, D) f32.
    w3p here is the exact-D (Dh, D) variant.  Returns the assembled (B, Nb+S_sep+S_txt, D)."""
    B, Nb, Din = additional_bs.shape
    _, S_sep, D = sep_emb.shape
    _, S_txt, _ = txt_emb.shape
    S_total = Nb + S_sep + S_txt
    Dh = w2p.shape[0]

    # Default: the whole batch in one grid step (launch overhead dominates at small B).
    # For large B on v7x, pass batch_block≈B/2 (with batch_block*Nb % 8 == 0) so both
    # TensorCores get a "parallel" grid step.
    bb = B if batch_block is None else max(1, min(batch_block, B))
    grid = (pl.cdiv(B, bb),)

    x2d = additional_bs.reshape(B * Nb, Din).astype(jnp.float32)   # free metadata reshape

    kernel = partial(_fused_tokenize_kernel, nb=Nb, s_sep=S_sep, s_txt=S_txt)
    return pl.pallas_call(
        kernel,
        out_shape=jax.ShapeDtypeStruct((B, S_total, D), out_dtype),
        grid_spec=pltpu.PrefetchScalarGridSpec(
            num_scalar_prefetch=0,
            grid=grid,
            in_specs=[
                pl.BlockSpec((bb * Nb, Din), lambda i: (i, 0)),     # brain features (f32, unpadded)
                pl.BlockSpec((Din, Dh), lambda i: (0, 0)),          # W1 (resident, bf16)
                pl.BlockSpec((1, Dh), lambda i: (0, 0)),            # b1 (f32)
                pl.BlockSpec((Dh, Dh), lambda i: (0, 0)),           # W2
                pl.BlockSpec((Dh, D), lambda i: (0, 0)),            # W3 (exact D output)
                pl.BlockSpec((bb, S_sep, D), lambda i: (i, 0, 0)),  # sep embeddings
                pl.BlockSpec((bb, S_txt, D), lambda i: (i, 0, 0)),  # text embeddings
            ],
            out_specs=pl.BlockSpec((bb, S_total, D), lambda i: (i, 0, 0)),
        ),
        compiler_params=pltpu.CompilerParams(
            dimension_semantics=("parallel",),
            vmem_limit_bytes=VMEM_LIMIT),
    )(x2d, w1p, b1p, w2p, w3p, sep_emb, txt_emb)


# -----------------------------------------------------------------------------
# Prompt_model (JAX/Pallas port)
# -----------------------------------------------------------------------------
class PromptModelJAX:
    def __init__(self, key, args, vocab_size=50, num_new_tokens=2):
        self.args = args
        D = args["word_embed_size"]
        Din = args["brain_embed_size"]
        self.D, self.Din = D, Din
        self.Dh = max(LANE, _round_up(Din, LANE))    # lane-padded hidden width
        self.Dop = max(LANE, _round_up(D, LANE))     # lane-padded standalone output width
        k = jax.random.split(key, 6)

        # synthetic wte (stands in for model.transformer.wte.weight)
        self.wte = (0.02 * jax.random.normal(k[0], (vocab_size, D))).astype(jnp.float32)

        # self.token_weights = stack of wte rows for the new tokens (last ids of vocab)
        new_token_ids = jnp.arange(vocab_size - num_new_tokens, vocab_size)
        self.token_weights = jnp.take(self.wte, new_token_ids, axis=0)

        # Encoding_model == MLP(brain_embed_size, word_embed_size, num_layers=2, relu, pos=False)
        # init_weights: nn.Linear weights ~ N(0, 0.01); bias keeps default uniform init.
        std = 0.01
        # PyTorch Linear stores (out, in); we keep the (in, out) transpose for x @ W.
        self.w1 = (std * jax.random.normal(k[1], (Din, Din))).astype(jnp.float32)
        bound = 1.0 / (Din ** 0.5)
        self.b1 = jax.random.uniform(k[2], (1, Din), minval=-bound, maxval=bound).astype(jnp.float32)
        self.w2 = (std * jax.random.normal(k[3], (Din, Din))).astype(jnp.float32)
        self.w3 = (std * jax.random.normal(k[4], (Din, D))).astype(jnp.float32)

        # bf16 matmul operands; hidden width lane-padded to Dh, K left at Din.
        self.w1_p = _pad_to(self.w1, (Din, self.Dh)).astype(jnp.bfloat16)
        self.b1_p = _pad_to(self.b1, (1, self.Dh))                       # f32
        self.w2_p = _pad_to(self.w2, (self.Dh, self.Dh)).astype(jnp.bfloat16)
        self.w3_out = _pad_to(self.w3, (self.Dh, D)).astype(jnp.bfloat16)        # fused: exact D
        self.w3_pad = _pad_to(self.w3, (self.Dh, self.Dop)).astype(jnp.bfloat16) # standalone: lane-dense

    # --- words2embedding (gpt2 branch): wte gather (layout glue) ---
    def words2embedding(self, input_ids):
        return jnp.take(self.wte, input_ids, axis=0)

    # --- get_tokens: embed sep tokens, overwrite last two with token_weights ---
    def get_tokens(self, content_prev_sep_ids):
        emb = self.words2embedding(content_prev_sep_ids)          # (B, S_sep, D)
        emb = emb.at[:, -1].set(self.token_weights[-1])
        emb = emb.at[:, -2].set(self.token_weights[-2])
        return emb

    # --- Encoding_model forward (standalone row-tiled Pallas MLP; used e.g. by additional_loss) ---
    def encoding_model(self, additional_bs):
        B, Nb, Din = additional_bs.shape
        x = additional_bs.reshape(B * Nb, Din).astype(jnp.float32)
        y = mlp_encoding_forward(x, self.w1_p, self.b1_p, self.w2_p, self.w3_pad, self.D)
        return y.reshape(B, Nb, self.D)

    # --- tokenize (use_fake=False / fake_input=0 ⇒ real encoding-model branch, gpt2 layout) ---
    def tokenize(self, content_all_ids, content_all_mask, additional_bs,
                 additional_bs_mask, content_prev_sep_ids):
        content_all = self.words2embedding(content_all_ids)       # (B, S_txt, D)
        sep = self.get_tokens(content_prev_sep_ids)                # (B, S_sep, D)
        # fused: batch-folded MLP + [sep[:,:1], mlp, sep[:,1:], content_all] assembly in one call
        content = fused_tokenize(additional_bs, self.w1_p, self.b1_p, self.w2_p,
                                 self.w3_out, sep, content_all)
        mask = jnp.concatenate([additional_bs_mask, content_all_mask], axis=-1)
        return content, mask

    # --- forward ---
    def forward(self, content_all_ids, content_all_mask, additional_bs,
                additional_bs_mask, content_prev_sep_ids):
        content_all, content_all_mask = self.tokenize(
            content_all_ids, content_all_mask, additional_bs,
            additional_bs_mask, content_prev_sep_ids)
        # TODO(synk): output = self.model(inputs_embeds=content_all, attention_mask=content_all_mask)
        #             (external pretrained LM) — returning its inputs instead.
        return content_all, content_all_mask


# -----------------------------------------------------------------------------
# main
# -----------------------------------------------------------------------------
if __name__ == "__main__":
    args = {
        "model_name": "gpt2",
        "brain_model": "mlp",
        "brain_embed_size": 32,
        "word_embed_size": 32,
        "pos": False,
        "input_method": "normal",
        "activation": "relu",
        "num_layers": 2,
        "dropout": 0.5,
        "fake_input": 0.0,
    }

    key = jax.random.PRNGKey(0)
    k_model, k_ids, k_bs = jax.random.split(key, 3)

    B, S_txt, S_sep, Nb = 2, 8, 3, 4
    vocab = 50
    Din = args["brain_embed_size"]

    model = PromptModelJAX(k_model, args, vocab_size=vocab)

    content_all_ids = jax.random.randint(k_ids, (B, S_txt), 0, vocab, dtype=jnp.int32)
    content_all_mask = jnp.ones((B, S_txt), dtype=jnp.int32)
    additional_bs = jax.random.normal(k_bs, (B, Nb, Din), dtype=jnp.float32)
    additional_bs_mask = jnp.ones((B, Nb + S_sep), dtype=jnp.int32)
    content_prev_sep_ids = jnp.array([[1, 2, 3], [1, 2, 3]], dtype=jnp.int32)

    content, mask = model.forward(content_all_ids, content_all_mask, additional_bs,
                                  additional_bs_mask, content_prev_sep_ids)
    content = jax.block_until_ready(content)
    mask = jax.block_until_ready(mask)

    # pure-JAX f32 reference of the MLP + assembly
    x = additional_bs.reshape(B * Nb, Din)
    h = jnp.maximum(x @ model.w1 + model.b1, 0.0)
    h = jnp.maximum(h @ model.w2, 0.0)
    ref_bs = (h @ model.w3).reshape(B, Nb, -1)
    sep_ref = model.get_tokens(content_prev_sep_ids)
    txt_ref = model.words2embedding(content_all_ids)
    ref_content = jnp.concatenate(
        [sep_ref[:, :1, :], ref_bs, sep_ref[:, 1:, :], txt_ref], axis=-2)

    # shapes
    assert content.shape == (B, S_sep + Nb + S_txt, args["word_embed_size"])
    assert mask.shape == (B, (Nb + S_sep) + S_txt)

    # fused forward path (bf16 MXU operands, f32 accum ⇒ modest tolerance)
    assert jnp.allclose(content, ref_content, atol=1e-4, rtol=5e-2), \
        float(jnp.max(jnp.abs(content - ref_content)))

    # standalone row-tiled MLP path
    enc = jax.block_until_ready(model.encoding_model(additional_bs))
    assert enc.shape == (B, Nb, args["word_embed_size"])
    assert jnp.allclose(enc, ref_bs, atol=1e-4, rtol=5e-2), \
        float(jnp.max(jnp.abs(enc - ref_bs)))

    print("KERNEL_OK")
</pallas_src>

<mosaic_0001>
module attributes {stable_mosaic.version = 11 : i64} {
  func.func @_fused_tokenize_kernel(%arg0: i32, %arg1: memref<8x32xf32, #tpu.memory_space<vmem>>, %arg2: memref<32x128xbf16, #tpu.memory_space<vmem>>, %arg3: memref<1x128xf32, #tpu.memory_space<vmem>>, %arg4: memref<128x128xbf16, #tpu.memory_space<vmem>>, %arg5: memref<128x32xbf16, #tpu.memory_space<vmem>>, %arg6: memref<2x3x32xf32, #tpu.memory_space<vmem>>, %arg7: memref<2x8x32xf32, #tpu.memory_space<vmem>>, %arg8: memref<2x15x32xf32, #tpu.memory_space<vmem>>) attributes {dimension_semantics = [#tpu.dimension_semantics<parallel>], iteration_bounds = array<i64: 1>, scalar_prefetch = 0 : i64, scratch_operands = 0 : i64, tpu.core_type = #tpu.core_type<tc>, window_params = [{transform_indices = @transform_0, window_bounds = array<i64: 8, 32>}, {pipeline_mode = #tpu.pipeline_mode<synchronous>, transform_indices = @transform_1, window_bounds = array<i64: 32, 128>}, {pipeline_mode = #tpu.pipeline_mode<synchronous>, transform_indices = @transform_2, window_bounds = array<i64: 1, 128>}, {pipeline_mode = #tpu.pipeline_mode<synchronous>, transform_indices = @transform_3, window_bounds = array<i64: 128, 128>}, {pipeline_mode = #tpu.pipeline_mode<synchronous>, transform_indices = @transform_4, window_bounds = array<i64: 128, 32>}, {transform_indices = @transform_5, window_bounds = array<i64: 2, 3, 32>}, {transform_indices = @transform_6, window_bounds = array<i64: 2, 8, 32>}, {transform_indices = @transform_7, window_bounds = array<i64: 2, 15, 32>}]} {
    %c0 = arith.constant 0 : index
    %c0_0 = arith.constant 0 : index
    %0 = vector.load %arg1[%c0, %c0_0] : memref<8x32xf32, #tpu.memory_space<vmem>>, vector<8x32xf32>
    %1 = arith.truncf %0 : vector<8x32xf32> to vector<8x32xbf16>
    %c0_1 = arith.constant 0 : index
    %c0_2 = arith.constant 0 : index
    %2 = vector.load %arg2[%c0_1, %c0_2] : memref<32x128xbf16, #tpu.memory_space<vmem>>, vector<32x128xbf16>
    %cst = arith.constant dense<0.000000e+00> : vector<8x128xf32>
    %3 = tpu.matmul %1, %2, %cst {dimension_numbers = #tpu.dot_dimension_numbers<[1], [0], [0], [1], [0, 0, 1, 1], [], []>} : vector<8x32xbf16>, vector<32x128xbf16>, vector<8x128xf32> -> vector<8x128xf32>
    %c0_3 = arith.constant 0 : index
    %c0_4 = arith.constant 0 : index
    %4 = vector.load %arg3[%c0_3, %c0_4] : memref<1x128xf32, #tpu.memory_space<vmem>>, vector<1x128xf32>
    %5 = vector.broadcast %4 : vector<1x128xf32> to vector<8x128xf32>
    %6 = arith.addf %3, %5 : vector<8x128xf32>
    %cst_5 = arith.constant 0.000000e+00 : f32
    %7 = vector.broadcast %cst_5 : f32 to vector<8x128xf32>
    %8 = arith.maximumf %6, %7 : vector<8x128xf32>
    %9 = arith.truncf %8 : vector<8x128xf32> to vector<8x128xbf16>
    %c0_6 = arith.constant 0 : index
    %c0_7 = arith.constant 0 : index
    %10 = vector.load %arg4[%c0_6, %c0_7] : memref<128x128xbf16, #tpu.memory_space<vmem>>, vector<128x128xbf16>
    %cst_8 = arith.constant dense<0.000000e+00> : vector<8x128xf32>
    %11 = tpu.matmul %9, %10, %cst_8 {dimension_numbers = #tpu.dot_dimension_numbers<[1], [0], [0], [1], [0, 0, 1, 1], [], []>} : vector<8x128xbf16>, vector<128x128xbf16>, vector<8x128xf32> -> vector<8x128xf32>
    %cst_9 = arith.constant 0.000000e+00 : f32
    %12 = vector.broadcast %cst_9 : f32 to vector<8x128xf32>
    %13 = arith.maximumf %11, %12 : vector<8x128xf32>
    %14 = arith.truncf %13 : vector<8x128xf32> to vector<8x128xbf16>
    %c0_10 = arith.constant 0 : index
    %c0_11 = arith.constant 0 : index
    %15 = vector.load %arg5[%c0_10, %c0_11] : memref<128x32xbf16, #tpu.memory_space<vmem>>, vector<128x32xbf16>
    %cst_12 = arith.constant dense<0.000000e+00> : vector<8x32xf32>
    %16 = tpu.matmul %14, %15, %cst_12 {dimension_numbers = #tpu.dot_dimension_numbers<[1], [0], [0], [1], [0, 0, 1, 1], [], []>} : vector<8x128xbf16>, vector<128x32xbf16>, vector<8x32xf32> -> vector<8x32xf32>
    %c0_13 = arith.constant 0 : index
    %c0_14 = arith.constant 0 : index
    %c0_15 = arith.constant 0 : index
    %17 = vector.load %arg6[%c0_13, %c0_14, %c0_15] : memref<2x3x32xf32, #tpu.memory_space<vmem>>, vector<2x3x32xf32>
    %c0_16 = arith.constant 0 : index
    %c0_17 = arith.constant 0 : index
    %c0_18 = arith.constant 0 : index
    %18 = vector.load %arg7[%c0_16, %c0_17, %c0_18] : memref<2x8x32xf32, #tpu.memory_space<vmem>>, vector<2x8x32xf32>
    %19 = vector.extract_strided_slice %17 {offsets = [0, 0, 0], sizes = [1, 1, 32], strides = [1, 1, 1]} : vector<2x3x32xf32> to vector<1x1x32xf32>
    %20 = vector.shape_cast %19 : vector<1x1x32xf32> to vector<1x32xf32>
    %c0_19 = arith.constant 0 : index
    %c0_20 = arith.constant 0 : index
    %c0_21 = arith.constant 0 : index
    %21 = vector.load %arg8[%c0_19, %c0_20, %c0_21] : memref<2x15x32xf32, #tpu.memory_space<vmem>>, vector<1x1x32xf32>
    %22 = vector.shape_cast %21 : vector<1x1x32xf32> to vector<1x32xf32>
    %23 = vector.shape_cast %20 : vector<1x32xf32> to vector<1x1x32xf32>
    tpu.vector_store %arg8[%c0_19, %c0_20, %c0_21], %23 {strides = array<i32>} : memref<2x15x32xf32, #tpu.memory_space<vmem>>, vector<1x1x32xf32>,
    %24 = vector.extract_strided_slice %16 {offsets = [0, 0], sizes = [4, 32], strides = [1, 1]} : vector<8x32xf32> to vector<4x32xf32>
    %c0_22 = arith.constant 0 : index
    %c1 = arith.constant 1 : index
    %c0_23 = arith.constant 0 : index
    %25 = vector.load %arg8[%c0_22, %c1, %c0_23] : memref<2x15x32xf32, #tpu.memory_space<vmem>>, vector<1x4x32xf32>
    %26 = vector.shape_cast %25 : vector<1x4x32xf32> to vector<4x32xf32>
    %27 = vector.shape_cast %24 : vector<4x32xf32> to vector<1x4x32xf32>
    tpu.vector_store %arg8[%c0_22, %c1, %c0_23], %27 {strides = array<i32>} : memref<2x15x32xf32, #tpu.memory_space<vmem>>, vector<1x4x32xf32>,
    %28 = vector.extract_strided_slice %17 {offsets = [0, 1, 0], sizes = [1, 2, 32], strides = [1, 1, 1]} : vector<2x3x32xf32> to vector<1x2x32xf32>
    %29 = vector.shape_cast %28 : vector<1x2x32xf32> to vector<2x32xf32>
    %c0_24 = arith.constant 0 : index
    %c5 = arith.constant 5 : index
    %c0_25 = arith.constant 0 : index
    %30 = vector.load %arg8[%c0_24, %c5, %c0_25] : memref<2x15x32xf32, #tpu.memory_space<vmem>>, vector<1x2x32xf32>
    %31 = vector.shape_cast %30 : vector<1x2x32xf32> to vector<2x32xf32>
    %32 = vector.shape_cast %29 : vector<2x32xf32> to vector<1x2x32xf32>
    tpu.vector_store %arg8[%c0_24, %c5, %c0_25], %32 {strides = array<i32>} : memref<2x15x32xf32, #tpu.memory_space<vmem>>, vector<1x2x32xf32>,
    %33 = vector.extract_strided_slice %18 {offsets = [0, 0, 0], sizes = [1, 8, 32], strides = [1, 1, 1]} : vector<2x8x32xf32> to vector<1x8x32xf32>
    %34 = vector.shape_cast %33 : vector<1x8x32xf32> to vector<8x32xf32>
    %c0_26 = arith.constant 0 : index
    %c7 = arith.constant 7 : index
    %c0_27 = arith.constant 0 : index
    %35 = vector.load %arg8[%c0_26, %c7, %c0_27] : memref<2x15x32xf32, #tpu.memory_space<vmem>>, vector<1x8x32xf32>
    %36 = vector.shape_cast %35 : vector<1x8x32xf32> to vector<8x32xf32>
    %37 = vector.shape_cast %34 : vector<8x32xf32> to vector<1x8x32xf32>
    tpu.vector_store %arg8[%c0_26, %c7, %c0_27], %37 {strides = array<i32>} : memref<2x15x32xf32, #tpu.memory_space<vmem>>, vector<1x8x32xf32>,
    %38 = vector.extract_strided_slice %17 {offsets = [1, 0, 0], sizes = [1, 1, 32], strides = [1, 1, 1]} : vector<2x3x32xf32> to vector<1x1x32xf32>
    %39 = vector.shape_cast %38 : vector<1x1x32xf32> to vector<1x32xf32>
    %c1_28 = arith.constant 1 : index
    %c0_29 = arith.constant 0 : index
    %c0_30 = arith.constant 0 : index
    %40 = vector.load %arg8[%c1_28, %c0_29, %c0_30] : memref<2x15x32xf32, #tpu.memory_space<vmem>>, vector<1x1x32xf32>
    %41 = vector.shape_cast %40 : vector<1x1x32xf32> to vector<1x32xf32>
    %42 = vector.shape_cast %39 : vector<1x32xf32> to vector<1x1x32xf32>
    tpu.vector_store %arg8[%c1_28, %c0_29, %c0_30], %42 {strides = array<i32>} : memref<2x15x32xf32, #tpu.memory_space<vmem>>, vector<1x1x32xf32>,
    %43 = vector.extract_strided_slice %16 {offsets = [4, 0], sizes = [4, 32], strides = [1, 1]} : vector<8x32xf32> to vector<4x32xf32>
    %c1_31 = arith.constant 1 : index
    %c1_32 = arith.constant 1 : index
    %c0_33 = arith.constant 0 : index
    %44 = vector.load %arg8[%c1_31, %c1_32, %c0_33] : memref<2x15x32xf32, #tpu.memory_space<vmem>>, vector<1x4x32xf32>
    %45 = vector.shape_cast %44 : vector<1x4x32xf32> to vector<4x32xf32>
    %46 = vector.shape_cast %43 : vector<4x32xf32> to vector<1x4x32xf32>
    tpu.vector_store %arg8[%c1_31, %c1_32, %c0_33], %46 {strides = array<i32>} : memref<2x15x32xf32, #tpu.memory_space<vmem>>, vector<1x4x32xf32>,
    %47 = vector.extract_strided_slice %17 {offsets = [1, 1, 0], sizes = [1, 2, 32], strides = [1, 1, 1]} : vector<2x3x32xf32> to vector<1x2x32xf32>
    %48 = vector.shape_cast %47 : vector<1x2x32xf32> to vector<2x32xf32>
    %c1_34 = arith.constant 1 : index
    %c5_35 = arith.constant 5 : index
    %c0_36 = arith.constant 0 : index
    %49 = vector.load %arg8[%c1_34, %c5_35, %c0_36] : memref<2x15x32xf32, #tpu.memory_space<vmem>>, vector<1x2x32xf32>
    %50 = vector.shape_cast %49 : vector<1x2x32xf32> to vector<2x32xf32>
    %51 = vector.shape_cast %48 : vector<2x32xf32> to vector<1x2x32xf32>
    tpu.vector_store %arg8[%c1_34, %c5_35, %c0_36], %51 {strides = array<i32>} : memref<2x15x32xf32, #tpu.memory_space<vmem>>, vector<1x2x32xf32>,
    %52 = vector.extract_strided_slice %18 {offsets = [1, 0, 0], sizes = [1, 8, 32], strides = [1, 1, 1]} : vector<2x8x32xf32> to vector<1x8x32xf32>
    %53 = vector.shape_cast %52 : vector<1x8x32xf32> to vector<8x32xf32>
    %c1_37 = arith.constant 1 : index
    %c7_38 = arith.constant 7 : index
    %c0_39 = arith.constant 0 : index
    %54 = vector.load %arg8[%c1_37, %c7_38, %c0_39] : memref<2x15x32xf32, #tpu.memory_space<vmem>>, vector<1x8x32xf32>
    %55 = vector.shape_cast %54 : vector<1x8x32xf32> to vector<8x32xf32>
    %56 = vector.shape_cast %53 : vector<8x32xf32> to vector<1x8x32xf32>
    tpu.vector_store %arg8[%c1_37, %c7_38, %c0_39], %56 {strides = array<i32>} : memref<2x15x32xf32, #tpu.memory_space<vmem>>, vector<1x8x32xf32>,
    return
  }
  func.func @transform_0(%arg0: i32) -> (i32, i32) {
    %c0_i32 = arith.constant 0 : i32
    %c0_i32_0 = arith.constant 0 : i32
    return %arg0, %c0_i32 : i32, i32
  }
  func.func @transform_1(%arg0: i32) -> (i32, i32) {
    %c0_i32 = arith.constant 0 : i32
    %c0_i32_0 = arith.constant 0 : i32
    %c0_i32_1 = arith.constant 0 : i32
    return %c0_i32, %c0_i32_0 : i32, i32
  }
  func.func @transform_2(%arg0: i32) -> (i32, i32) {
    %c0_i32 = arith.constant 0 : i32
    %c0_i32_0 = arith.constant 0 : i32
    %c0_i32_1 = arith.constant 0 : i32
    return %c0_i32, %c0_i32_0 : i32, i32
  }
  func.func @transform_3(%arg0: i32) -> (i32, i32) {
    %c0_i32 = arith.constant 0 : i32
    %c0_i32_0 = arith.constant 0 : i32
    %c0_i32_1 = arith.constant 0 : i32
    return %c0_i32, %c0_i32_0 : i32, i32
  }
  func.func @transform_4(%arg0: i32) -> (i32, i32) {
    %c0_i32 = arith.constant 0 : i32
    %c0_i32_0 = arith.constant 0 : i32
    %c0_i32_1 = arith.constant 0 : i32
    return %c0_i32, %c0_i32_0 : i32, i32
  }
  func.func @transform_5(%arg0: i32) -> (i32, i32, i32) {
    %c0_i32 = arith.constant 0 : i32
    %c0_i32_0 = arith.constant 0 : i32
    %c0_i32_1 = arith.constant 0 : i32
    return %arg0, %c0_i32, %c0_i32_0 : i32, i32, i32
  }
  func.func @transform_6(%arg0: i32) -> (i32, i32, i32) {
    %c0_i32 = arith.constant 0 : i32
    %c0_i32_0 = arith.constant 0 : i32
    %c0_i32_1 = arith.constant 0 : i32
    return %arg0, %c0_i32, %c0_i32_0 : i32, i32, i32
  }
  func.func @transform_7(%arg0: i32) -> (i32, i32, i32) {
    %c0_i32 = arith.constant 0 : i32
    %c0_i32_0 = arith.constant 0 : i32
    %c0_i32_1 = arith.constant 0 : i32
    return %arg0, %c0_i32, %c0_i32_0 : i32, i32, i32
  }
}

</mosaic_0001>

<bundles_post_ra>
// kernel: tpu_custom_call.1
= control target key start
LH: loop header
LB: loop body
LE: loop exit
PB: predicated region body
PF: predicated region fallthrough
CT: control target
= control target key end

     0   :  { %12 = vsyncpa [#allocation3], 0  ;;  %s566_s0 = inlined_call_operand.hbm [shape: f32[8,32], index: 0, kind: input, shape index: {}]   ;;  %s567_s1 = inlined_call_operand.vmem [shape: bf16[32,128], index: 1, kind: input, shape index: {}]   ;;  %s568_s2 = inlined_call_operand.vmem [shape: f32[1,128], index: 2, kind: input, shape index: {}]   ;;  %s569_s3 = inlined_call_operand.vmem [shape: bf16[128,128], index: 3, kind: input, shape index: {}]   ;;  %s570_s4 = inlined_call_operand.vmem [shape: bf16[128,32], index: 4, kind: input, shape index: {}]   ;;  %s571_s5 = inlined_call_operand.vmem [shape: f32[2,3,32], index: 5, kind: input, shape index: {}]   ;;  %s572_s6 = inlined_call_operand.hbm [shape: f32[2,8,32], index: 6, kind: input, shape index: {}]   ;;  %s573_s7 = inlined_call_operand.vmem [shape: f32[2,15,32], index: 7, kind: output, shape index: {}]  }
   0x1   :  { %s19_s26 = sshll.u32 %s566_s0, 4  ;;  %s20_s26 = int_to_ptr.hbm [resolvable:$true] %s19_s26 }
   0x2   :  { %13 = vsyncpa [#allocation5], 0  ;;  %s429_s27 = smov [#allocation2]   ;;  %s39_s8 = sshll.u32 %s572_s6, 4  ;;  %s40_s8 = int_to_ptr.hbm [resolvable:$true] %s39_s8 }
   0x3   :  { %s21_s28 = sshll.u32 %s429_s27, 4  ;;  %s430_s9 = smov [#allocation4]   ;;  %s22_s28 = int_to_ptr.vmem [resolvable:$true] %s21_s28 }
   0x4   :  { %24 = dma.hbm_to_vmem [thread:$0]  %s20_s26, 128, %s22_s28, [#allocation3]  }
   0x5   :  { %s41_s10 = sshll.u32 %s430_s9, 4  ;;  %s431_s11 = smov 128   ;;  %s42_s10 = int_to_ptr.vmem [resolvable:$true] %s41_s10 }
   0x6   :  { %s432_s12 = smov 8  }
   0x7   :  { %47 = dma.hbm_to_vmem [thread:$0]  %s40_s8, 256, %s42_s10, [#allocation5], %s431_s11, %s431_s11, %s432_s12  }
   0x8   :  { %425 = dma.done.wait [#allocation3], 128  }
   0x9   :  { %426 = vsyncadd [#allocation3], 4294967168 }
   0xa   :  { %427 = dma.done.wait [#allocation5], 256  }
   0xb   :  { %428 = vsyncadd [#allocation5], 4294967040  ;;  %vm258_vm0 = vcmask 253952   ;;  %vm262_vm1 = vcmask 256001   ;;  %v254_v0 = vld [vmem:[%s571_s5] sm:$0x7] }
   0xc   :  { %v255_v1 = vld [vmem:[%s571_s5 + $0x4] sm:$0x7]  ;;  %v355_v2 = vld [vmem:[%s567_s1 + $0x8] sm:$0xff]  ;;  %259 = vst.msk [vmem:[%s573_s7] sm:$0x1] %vm258_vm0, %v254_v0  ;;  %v363_v6 = vld [vmem:[%s569_s3 + $0x38] sm:$0xff] }
   0xd   :  { %v354_v3 = vld [vmem:[%s567_s1] sm:$0xff]  ;;  %263 = vst.msk [vmem:[%s573_s7 + $0x4] sm:$0x6] %vm262_vm1, %v254_v0  ;;  %89 = vmatpush.bf16.msra.mxu0 %v355_v2  ;;  %v256_v5 = vld [vmem:[#allocation4] sm:$0xff]  ;;  %v257_v7 = vld [vmem:[#allocation4 + $0x8] sm:$0xff]  ;;  %vm79_vm2 = vcmask 261120   ;;  %162 = vmatpush.bf16.msra.mxu1 %v363_v6 }
   0xe   :  { %v57_v4 = vld [vmem:[#allocation2] sm:$0xff]  ;;  %350 = vst.msk [vmem:[%s573_s7 + $0x10] sm:$0x1] %vm258_vm0, %v255_v1  ;;  %v362_v8 = vld [vmem:[%s569_s3 + $0x30] sm:$0xff]  ;;  %v361_v10 = vld [vmem:[%s569_s3 + $0x28] sm:$0xff]  ;;  %vm260_vm3 = vcmask 257024  }
   0xf   :  { %352 = vst.msk [vmem:[%s573_s7 + $0x14] sm:$0x6] %vm262_vm1, %v255_v1  ;;  %v58_v9 = vpack.c.bf16 %v57_v4, %v57_v4  ;;  %v360_v11 = vld [vmem:[%s569_s3 + $0x20] sm:$0xff]  ;;  %v359_v12 = vld [vmem:[%s569_s3 + $0x18] sm:$0xff]  ;;  %v358_v13 = vld [vmem:[%s569_s3 + $0x10] sm:$0xff]  ;;  %vm267_vm4 = vcmask 261124  }
  0x10   :  { %264 = vst.msk [vmem:[%s573_s7 + $0x7] sm:$0xff] %vm79_vm2, %v256_v5  ;;  %v357_v14 = vld [vmem:[%s569_s3 + $0x8] sm:$0xff]  ;;  %v356_v15 = vld [vmem:[%s569_s3] sm:$0xff]  ;;  %v371_v16 = vld [vmem:[%s570_s4 + $0x38] sm:$0xff] }
  0x11   :  { %90 = vmatpush.bf16.msra.mxu0 %v354_v3  ;;  %353 = vst.msk [vmem:[%s573_s7 + $0x17] sm:$0xff] %vm79_vm2, %v257_v7  ;;  %163 = vmatpush.bf16.msra.mxu1 %v362_v8  ;;  %v370_v17 = vld [vmem:[%s570_s4 + $0x30] sm:$0xff]  ;;  %v369_v18 = vld [vmem:[%s570_s4 + $0x28] sm:$0xff]  ;;  %v368_v19 = vld [vmem:[%s570_s4 + $0x20] sm:$0xff] }
  0x12   :  { %241 = vmatpush.bf16.msra.mxu2 %v371_v16  ;;  %v367_v20 = vld [vmem:[%s570_s4 + $0x18] sm:$0xff]  ;;  %v366_v21 = vld [vmem:[%s570_s4 + $0x10] sm:$0xff]  ;;  %v376_v22 = vld [vmem:[%s568_s2] ss:$0 sm:$0xff] }
  0x13   :  { %v365_v23 = vld [vmem:[%s570_s4 + $0x8] sm:$0xff]  ;;  %v364_v29 = vld [vmem:[%s570_s4] sm:$0xff] }
  0x14   :  { %285 = vmatmul.msk.bf16.vlgmr.msra.gmra.mxu0 %vm79_vm2, %v58_v9 }
  0x15   :  { %164 = vmatpush.bf16.msra.mxu1 %v361_v10 }
  0x16   :  { %242 = vmatpush.bf16.msra.mxu2 %v370_v17 }
  0x19   :  { %165 = vmatpush.bf16.msra.mxu1 %v360_v11 }
  0x1a   :  { %243 = vmatpush.bf16.msra.mxu2 %v369_v18 }
  0x1d   :  { %166 = vmatpush.bf16.msra.mxu1 %v359_v12 }
  0x1e   :  { %244 = vmatpush.bf16.msra.mxu2 %v368_v19 }
  0x21   :  { %167 = vmatpush.bf16.msra.mxu1 %v358_v13 }
  0x22   :  { %245 = vmatpush.bf16.msra.mxu2 %v367_v20 }
  0x25   :  { %168 = vmatpush.bf16.msra.mxu1 %v357_v14 }
  0x26   :  { %246 = vmatpush.bf16.msra.mxu2 %v366_v21 }
  0x29   :  { %169 = vmatpush.bf16.msra.mxu1 %v356_v15 }
  0x2a   :  { %247 = vmatpush.bf16.msra.mxu2 %v365_v23 }
  0x2e   :  { %248 = vmatpush.bf16.msra.mxu2 %v364_v29 }
  0x91   :  { %v92_v24 = vpop.f32.mrf.mxu0 }
  0x92   :  { %v93_v25 = vadd.f32 %v376_v22, %v92_v24 }
  0x94   :  { %v96_v26 = vmax.f32 %v93_v25, 0.0 }
  0x96   :  { %v97_v27 = vpack.c.bf16 %v96_v26, %v96_v26 }
  0x98   :  { %170 = vmatmul.bf16.vlgmr.msra.gmra.mxu1 %v97_v27 }
  0x99   :  { %v94_v28 = vpop.f32.mrf.mxu0 }
 0x115   :  { %v171_v30 = vpop.f32.mrf.mxu1 }
 0x116   :  { %v175_v31 = vmax.f32 %v171_v30, 0.0 }
 0x118   :  { %v176_v32 = vpack.c.bf16 %v175_v31, %v175_v31 }
 0x11a   :  { %249 = vmatmul.bf16.vlgmr.msra.gmra.mxu2 %v176_v32 }
 0x11d   :  { %v173_v33 = vpop.f32.mrf.mxu1 }
 0x19d   :  { %v250_v34 = vpop.f32.mrf.mxu2 }
 0x19e   :  { %261 = vst.msk [vmem:[%s573_s7 + $0x1] sm:$0xf] %vm260_vm3, %v250_v34 }
 0x19f   :  { %351 = vst.msk [vmem:[%s573_s7 + $0xd] sm:$0xf0] %vm267_vm4, %v250_v34 }
 0x1a5   :  { %v252_v35 = vpop.f32.mrf.mxu2 }
 0x1a6   :  { %275 = vsyncpa [#allocation3], 1 }
 0x1a7   :  { %276 = vsyncpa [#allocation5], 1 }

</bundles_post_ra>
